<compile_context>
chip_gen: v7x
topology: tpu7x:2x2x1
jax: 0.10.0
libtpu: 0.0.40
codegen_flags: <defaults>
</compile_context>

<pallas_src>
import jax
import jax.numpy as jnp
from jax import lax
from jax.experimental import pallas as pl
from jax.experimental.pallas import tpu as pltpu


_HW_CHUNK = 512          # lane-dense chunk of the HW axis (multiple of 128)
_MAX_STATIC_CHUNKS = 16  # above this, drive the chunk loop with lax.fori_loop
_SLACK = 2 << 20         # headroom for Mosaic internal scratch


def _round_up(x, m):
    return (x + m - 1) // m * m


def _sublane_multiple(dtype):
    # f32 -> 8, bf16 -> 16, int8/fp8 -> 32 (sub-32-bit packs along sublanes).
    return max(8, 32 // jnp.dtype(dtype).itemsize)


def _padded_bytes_2d(rows, cols, dtype):
    """VMEM footprint of a (rows, cols) tile including (sublane,128) padding."""
    return (_round_up(rows, _sublane_multiple(dtype))
            * _round_up(cols, 128) * jnp.dtype(dtype).itemsize)


def _vmem_budget_bytes():
    """Generation-aware budget: ~3/4 of physical VMEM capacity
    (v5e/v6e: 128 MiB -> ~96 MiB; v7x: 64 MiB per TC -> ~48 MiB)."""
    cap = 64 << 20  # conservative fallback (v7x per-TC)
    try:
        cap = int(getattr(pltpu.get_tpu_info(), "vmem_capacity_bytes", cap))
    except Exception:
        pass
    return (cap * 3) // 4


def _hw_chunks(hw):
    n_full = hw // _HW_CHUNK
    return n_full, hw - n_full * _HW_CHUNK


def _pick_batch_block(n, per_image_bytes, weight_bytes, budget):
    """Largest batch block nb (dividing n) whose double-buffered in+out tiles
    (padded) fit the budget.  Prefers >= 2 grid steps (pipeline overlap) and an
    EVEN grid count (balanced megacore split on v7x).  Returns 0 if even a
    single image slab does not fit -> caller uses the two-pass fallback."""
    avail = budget - weight_bytes - _SLACK
    if avail <= 0 or 4 * per_image_bytes > avail:
        return 0
    max_nb = avail // (4 * per_image_bytes)
    feasible = [d for d in range(1, n + 1)
                if n % d == 0 and d <= max_nb and (n < 2 or n // d >= 2)]
    if not feasible:
        return 0
    even = [d for d in feasible if (n // d) % 2 == 0]
    return max(even) if even else max(feasible)


def _pick_channel_tile(c, hw, dtype, budget):
    """Channel-group size for the two-pass fallback: largest divisor of c that
    is a multiple of the sublane tile (or c itself) whose double-buffered
    in+out (c_tile, HW) blocks fit the budget.  Returns 0 if nothing fits."""
    sub = _sublane_multiple(dtype)
    per_chan = _round_up(hw, 128) * jnp.dtype(dtype).itemsize
    avail = budget - _SLACK
    best = 0
    for cand in range(1, c + 1):
        if c % cand:
            continue
        if cand != c and cand % sub:
            continue
        if 4 * cand * per_chan > avail:
            break
        best = cand
    return best


# --------------------------------------------------------------------------
# Single-pass kernel: one (Nb, C, HW) block per grid step.
# --------------------------------------------------------------------------
def _make_se_kernel(hw, io_dtype):
    n_full, tail = _hw_chunks(hw)
    inv_hw = 1.0 / float(hw)
    use_fori = n_full > _MAX_STATIC_CHUNKS

    def kernel(x_ref, w1_ref, w2_ref, o_ref):
        # x_ref/o_ref: (Nb, C, HW)   w1_ref: (C, Cr)   w2_ref: (Cr, C)
        nb, c = x_ref.shape[0], x_ref.shape[1]

        # ---- Squeeze: chunked f32 sum over the HW (lane) axis -> mean (Nb, C).
        def sum_static(lo, acc):
            xc = x_ref[:, :, lo:lo + _HW_CHUNK].astype(jnp.float32)
            return acc + jnp.sum(xc, axis=-1)

        def sum_dyn(j, acc):
            lo = pl.multiple_of(j * _HW_CHUNK, 128)
            xc = x_ref[:, :, pl.ds(lo, _HW_CHUNK)].astype(jnp.float32)
            return acc + jnp.sum(xc, axis=-1)

        acc = jnp.zeros((nb, c), jnp.float32)
        if use_fori:
            acc = lax.fori_loop(0, n_full, sum_dyn, acc)
        else:
            for j in range(n_full):
                acc = sum_static(j * _HW_CHUNK, acc)
        if tail:
            lo = n_full * _HW_CHUNK
            acc = acc + jnp.sum(x_ref[:, :, lo:hw].astype(jnp.float32), axis=-1)
        y = acc * inv_hw                                               # (Nb, C)

        # ---- Excitation: FC -> ReLU -> FC -> Sigmoid (tiny, f32 MXU + EUP).
        h = jnp.maximum(
            jnp.dot(y, w1_ref[...].astype(jnp.float32),
                    preferred_element_type=jnp.float32), 0.0)          # (Nb, Cr)
        s = jax.nn.sigmoid(
            jnp.dot(h, w2_ref[...].astype(jnp.float32),
                    preferred_element_type=jnp.float32))               # (Nb, C)

        # Hoisted broadcast + cast (JAX does not CSE broadcast_in_dim).  The
        # scale multiply runs in the I/O dtype (no f32 round-trip in the loop
        # -> bf16 VALU path on v6e/v7x when x is bf16).
        s3 = s.astype(io_dtype)[:, :, None]                            # (Nb, C, 1)

        # ---- Scale: re-read x chunk-by-chunk from VMEM (low vreg pressure;
        # lane-dense loads/stores except the single ragged tail chunk).
        def scale_static(lo):
            o_ref[:, :, lo:lo + _HW_CHUNK] = x_ref[:, :, lo:lo + _HW_CHUNK] * s3

        def scale_dyn(j, carry):
            lo = pl.multiple_of(j * _HW_CHUNK, 128)
            o_ref[:, :, pl.ds(lo, _HW_CHUNK)] = (
                x_ref[:, :, pl.ds(lo, _HW_CHUNK)] * s3)
            return carry

        if use_fori:
            lax.fori_loop(0, n_full, scale_dyn, 0)
        else:
            for j in range(n_full):
                scale_static(j * _HW_CHUNK)
        if tail:
            lo = n_full * _HW_CHUNK
            o_ref[:, :, lo:hw] = x_ref[:, :, lo:hw] * s3

    return kernel


# --------------------------------------------------------------------------
# Two-pass fallback kernels (one (1, c_tile, HW) strip per grid step).
# --------------------------------------------------------------------------
def _make_mean_kernel(hw, c_tile, c_lane):
    n_full, tail = _hw_chunks(hw)
    inv_hw = 1.0 / float(hw)
    use_fori = n_full > _MAX_STATIC_CHUNKS

    def kernel(x_ref, m_ref):
        # x_ref: (1, c_tile, HW)   m_ref: (1, 1, 8, c_lane) f32
        def sum_static(lo, acc):
            xc = x_ref[:, :, lo:lo + _HW_CHUNK].astype(jnp.float32)
            return acc + jnp.sum(xc, axis=-1)

        def sum_dyn(j, acc):
            lo = pl.multiple_of(j * _HW_CHUNK, 128)
            xc = x_ref[:, :, pl.ds(lo, _HW_CHUNK)].astype(jnp.float32)
            return acc + jnp.sum(xc, axis=-1)

        acc = jnp.zeros((1, c_tile), jnp.float32)
        if use_fori:
            acc = lax.fori_loop(0, n_full, sum_dyn, acc)
        else:
            for j in range(n_full):
                acc = sum_static(j * _HW_CHUNK, acc)
        if tail:
            lo = n_full * _HW_CHUNK
            acc = acc + jnp.sum(x_ref[:, :, lo:hw].astype(jnp.float32), axis=-1)
        mean = acc * inv_hw                                          # (1, c_tile)

        tile = jnp.zeros((8, c_lane), jnp.float32)
        tile = tile.at[0:1, 0:c_tile].set(mean)
        m_ref[...] = tile[None, None, :, :]

    return kernel


def _make_scale_kernel(hw, c_tile):
    n_full, tail = _hw_chunks(hw)
    use_fori = n_full > _MAX_STATIC_CHUNKS

    def kernel(x_ref, s_ref, o_ref):
        # x_ref/o_ref: (1, c_tile, HW)   s_ref: (1, 1, c_sub, 128) in I/O dtype
        s_full = s_ref[...]                                # tiny, loaded once
        s3 = s_full[0, 0, :c_tile, :1][None, :, :]         # (1, c_tile, 1), hoisted

        def scale_static(lo):
            o_ref[:, :, lo:lo + _HW_CHUNK] = x_ref[:, :, lo:lo + _HW_CHUNK] * s3

        def scale_dyn(j, carry):
            lo = pl.multiple_of(j * _HW_CHUNK, 128)
            o_ref[:, :, pl.ds(lo, _HW_CHUNK)] = (
                x_ref[:, :, pl.ds(lo, _HW_CHUNK)] * s3)
            return carry

        if use_fori:
            lax.fori_loop(0, n_full, scale_dyn, 0)
        else:
            for j in range(n_full):
                scale_static(j * _HW_CHUNK)
        if tail:
            lo = n_full * _HW_CHUNK
            o_ref[:, :, lo:hw] = x_ref[:, :, lo:hw] * s3

    return kernel


def _se_layer_two_pass(x_flat, w1, w2, budget):
    """Fallback when a single (C, HW) image slab (x4 buffers, padded) does not
    fit in VMEM (hit first on v7x's 64 MiB/TC).  Pass 1 reduces per-(N, C)
    means over channel-group strips, the tiny excitation runs as plain XLA,
    pass 2 is an elementwise scale kernel over the same strips.  Costs
    2 reads + 1 write of x instead of 1 + 1, but handles large spatial maps."""
    n, c, hw = x_flat.shape
    dtype = x_flat.dtype

    c_tile = _pick_channel_tile(c, hw, dtype, budget)
    if c_tile == 0:
        # TODO(synk): a single (sublane-group, HW) strip exceeds VMEM; needs HW
        # tiling with masked reductions, not implemented.
        raise NotImplementedError(
            "SE two-pass fallback: spatial size too large for VMEM.")
    c_groups = c // c_tile
    c_lane = _round_up(c_tile, 128)
    c_sub = _round_up(c_tile, 8)
    vmem_limit = int(budget)

    # ---- Pass 1: per-(N, C) means (f32), tiled over (batch, channel groups).
    mean4 = pl.pallas_call(
        _make_mean_kernel(hw, c_tile, c_lane),
        out_shape=jax.ShapeDtypeStruct((n, c_groups, 8, c_lane), jnp.float32),
        grid=(n, c_groups),
        in_specs=[pl.BlockSpec((1, c_tile, hw), lambda i, g: (i, g, 0))],
        out_specs=pl.BlockSpec((1, 1, 8, c_lane), lambda i, g: (i, g, 0, 0)),
        compiler_params=pltpu.CompilerParams(
            dimension_semantics=("parallel", "parallel"),
            vmem_limit_bytes=vmem_limit),
    )(x_flat)
    y = mean4[:, :, 0, :c_tile].reshape(n, c)                      # (N, C) f32

    # ---- Excitation: tiny (N,C) matmuls; plain XLA is already at roofline.
    h = jnp.maximum(y @ w1.astype(jnp.float32), 0.0)
    s = jax.nn.sigmoid(h @ w2.astype(jnp.float32)).astype(dtype)   # (N, C)

    # Gate carrier laid out with channels on sublanes (no in-kernel transpose):
    # (N, c_groups, c_sub, 128) with the gate values in lane 0.
    gate4 = jnp.zeros((n, c_groups, c_sub, 128), dtype)
    gate4 = gate4.at[:, :, :c_tile, 0].set(s.reshape(n, c_groups, c_tile))

    # ---- Pass 2: elementwise scale over the same (batch, channel-group) strips.
    out_flat = pl.pallas_call(
        _make_scale_kernel(hw, c_tile),
        out_shape=jax.ShapeDtypeStruct((n, c, hw), dtype),
        grid=(n, c_groups),
        in_specs=[pl.BlockSpec((1, c_tile, hw), lambda i, g: (i, g, 0)),
                  pl.BlockSpec((1, 1, c_sub, 128), lambda i, g: (i, g, 0, 0))],
        out_specs=pl.BlockSpec((1, c_tile, hw), lambda i, g: (i, g, 0)),
        compiler_params=pltpu.CompilerParams(
            dimension_semantics=("parallel", "parallel"),
            vmem_limit_bytes=vmem_limit),
    )(x_flat, gate4)
    return out_flat


# --------------------------------------------------------------------------
# Public wrapper.
# --------------------------------------------------------------------------
def se_layer(x_nchw, w1, w2, *, vmem_budget_bytes=None, donate_x=False,
             _force_two_pass=False):
    """Squeeze-and-Excitation forward.

    x_nchw: (N, C, H, W); w1: (C, C//r); w2: (C//r, C) (pre-transposed
    nn.Linear weights so the squeeze vector right-multiplies them).
      out = x * sigmoid(relu(mean_hw(x) @ w1) @ w2)[:, :, None, None]
    """
    n, c, h, w = x_nchw.shape
    hw = h * w
    dtype = x_nchw.dtype
    # NOTE: layout stays NCHW (HW on lanes).  If the surrounding model already
    # provides channels-last activations, a (nb, HW, C) block with C on lanes
    # gives fully lane-dense stores when HW % 128 != 0; a standalone transpose
    # pass just for that would cost more HBM traffic than it saves.
    x_flat = x_nchw.reshape(n, c, hw)

    budget = (int(vmem_budget_bytes) if vmem_budget_bytes is not None
              else _vmem_budget_bytes())

    # Padded ((sublane,128) tiling) footprints so the picker and the declared
    # vmem_limit agree with what Mosaic actually allocates.
    per_image = _padded_bytes_2d(c, hw, dtype)
    weight_bytes = 2 * (_padded_bytes_2d(*w1.shape, w1.dtype)
                        + _padded_bytes_2d(*w2.shape, w2.dtype))

    nb = 0 if _force_two_pass else _pick_batch_block(
        n, per_image, weight_bytes, budget)
    if nb == 0:
        return _se_layer_two_pass(x_flat, w1, w2, budget).reshape(n, c, h, w)

    grid_n = n // nb
    vmem_limit = int(budget)   # one number drives both picker and limit

    out_flat = pl.pallas_call(
        _make_se_kernel(hw, dtype),
        out_shape=jax.ShapeDtypeStruct((n, c, hw), dtype),
        grid=(grid_n,),
        in_specs=[
            pl.BlockSpec((nb, c, hw), lambda i: (i, 0, 0)),   # x: batch tiles
            pl.BlockSpec(w1.shape, lambda i: (0, 0)),         # weights resident
            pl.BlockSpec(w2.shape, lambda i: (0, 0)),
        ],
        out_specs=pl.BlockSpec((nb, c, hw), lambda i: (i, 0, 0)),
        compiler_params=pltpu.CompilerParams(
            dimension_semantics=("parallel",),                # megacore sharding
            vmem_limit_bytes=vmem_limit),
        # Optional: donate x so the scale is in-place in HBM (caller must not
        # reuse x afterwards).
        input_output_aliases=({0: 0} if donate_x else {}),
    )(x_flat, w1, w2)
    return out_flat.reshape(n, c, h, w)


def _reference(x_nchw, w1, w2):
    y = jnp.mean(x_nchw, axis=(2, 3))            # (N, C)
    hdn = jnp.maximum(y @ w1, 0.0)               # (N, C//r)
    s = jax.nn.sigmoid(hdn @ w2)                 # (N, C)
    return x_nchw * s[:, :, None, None]


if __name__ == "__main__":
    key = jax.random.PRNGKey(0)
    k_x, k_w1, k_w2 = jax.random.split(key, 3)

    # Small shapes consistent with the module: batch=2, channels=4, spatial=16.
    N, C, H, W = 2, 4, 16, 16
    reduction = 2
    Cr = C // reduction

    x = jax.random.normal(k_x, (N, C, H, W), dtype=jnp.float32)
    # nn.Linear(channel, channel//r, bias=False) / nn.Linear(channel//r,
    # channel, bias=False) weights, pre-transposed so the kernel does y @ w.
    w1 = jax.random.normal(k_w1, (C, Cr), dtype=jnp.float32) * 0.5
    w2 = jax.random.normal(k_w2, (Cr, C), dtype=jnp.float32) * 0.5

    ref = _reference(x, w1, w2)

    # Main single-pass path.
    out = jax.block_until_ready(se_layer(x, w1, w2))
    assert out.shape == (N, C, H, W)
    assert jnp.allclose(out, ref, atol=1e-5, rtol=1e-5), "single-pass mismatch"

    # Two-pass fallback path (the "slab too big for VMEM" case), exercised
    # explicitly at the small demo shape for correctness.
    out2 = jax.block_until_ready(se_layer(x, w1, w2, _force_two_pass=True))
    assert jnp.allclose(out2, ref, atol=1e-5, rtol=1e-5), "two-pass mismatch"

    print("KERNEL_OK")
</pallas_src>

<mosaic_0001>
module attributes {stable_mosaic.version = 11 : i64} {
  func.func @kernel(%arg0: i32, %arg1: memref<1x4x256xf32, #tpu.memory_space<vmem>>, %arg2: memref<4x2xf32, #tpu.memory_space<vmem>>, %arg3: memref<2x4xf32, #tpu.memory_space<vmem>>, %arg4: memref<1x4x256xf32, #tpu.memory_space<vmem>>) attributes {dimension_semantics = [#tpu.dimension_semantics<parallel>], iteration_bounds = array<i64: 2>, scalar_prefetch = 0 : i64, scratch_operands = 0 : i64, tpu.core_type = #tpu.core_type<tc>, window_params = [{transform_indices = @transform_0, window_bounds = array<i64: 1, 4, 256>}, {pipeline_mode = #tpu.pipeline_mode<synchronous>, transform_indices = @transform_1, window_bounds = array<i64: 4, 2>}, {pipeline_mode = #tpu.pipeline_mode<synchronous>, transform_indices = @transform_2, window_bounds = array<i64: 2, 4>}, {transform_indices = @transform_3, window_bounds = array<i64: 1, 4, 256>}]} {
    %cst = arith.constant 0.000000e+00 : f32
    %0 = vector.broadcast %cst : f32 to vector<1x4xf32>
    %c0 = arith.constant 0 : index
    %c0_0 = arith.constant 0 : index
    %c0_1 = arith.constant 0 : index
    %1 = vector.load %arg1[%c0, %c0_0, %c0_1] : memref<1x4x256xf32, #tpu.memory_space<vmem>>, vector<1x4x256xf32>
    %cst_2 = arith.constant dense<0.000000e+00> : vector<1x4xf32>
    %2 = vector.multi_reduction <add>, %1, %cst_2 [2] : vector<1x4x256xf32> to vector<1x4xf32>
    %3 = arith.addf %0, %2 : vector<1x4xf32>
    %cst_3 = arith.constant 3.906250e-03 : f32
    %4 = vector.broadcast %cst_3 : f32 to vector<1x4xf32>
    %5 = arith.mulf %3, %4 : vector<1x4xf32>
    %c0_4 = arith.constant 0 : index
    %c0_5 = arith.constant 0 : index
    %6 = vector.load %arg2[%c0_4, %c0_5] : memref<4x2xf32, #tpu.memory_space<vmem>>, vector<4x2xf32>
    %cst_6 = arith.constant dense<0.000000e+00> : vector<1x2xf32>
    %7 = tpu.matmul %5, %6, %cst_6 {dimension_numbers = #tpu.dot_dimension_numbers<[1], [0], [0], [1], [0, 0, 1, 1], [], []>} : vector<1x4xf32>, vector<4x2xf32>, vector<1x2xf32> -> vector<1x2xf32>
    %cst_7 = arith.constant 0.000000e+00 : f32
    %8 = vector.broadcast %cst_7 : f32 to vector<1x2xf32>
    %9 = arith.maximumf %7, %8 : vector<1x2xf32>
    %c0_8 = arith.constant 0 : index
    %c0_9 = arith.constant 0 : index
    %10 = vector.load %arg3[%c0_8, %c0_9] : memref<2x4xf32, #tpu.memory_space<vmem>>, vector<2x4xf32>
    %cst_10 = arith.constant dense<0.000000e+00> : vector<1x4xf32>
    %11 = tpu.matmul %9, %10, %cst_10 {dimension_numbers = #tpu.dot_dimension_numbers<[1], [0], [0], [1], [0, 0, 1, 1], [], []>} : vector<1x2xf32>, vector<2x4xf32>, vector<1x4xf32> -> vector<1x4xf32>
    %12 = arith.negf %11 : vector<1x4xf32>
    %13 = math.exp %12 : vector<1x4xf32>
    %cst_11 = arith.constant 1.000000e+00 : f32
    %14 = vector.broadcast %cst_11 : f32 to vector<1x4xf32>
    %15 = arith.addf %14, %13 : vector<1x4xf32>
    %16 = arith.divf %14, %15 : vector<1x4xf32>
    %17 = vector.shape_cast %16 : vector<1x4xf32> to vector<1x4x1xf32>
    %c0_12 = arith.constant 0 : index
    %c0_13 = arith.constant 0 : index
    %c0_14 = arith.constant 0 : index
    %18 = vector.load %arg1[%c0_12, %c0_13, %c0_14] : memref<1x4x256xf32, #tpu.memory_space<vmem>>, vector<1x4x256xf32>
    %19 = vector.broadcast %17 : vector<1x4x1xf32> to vector<1x4x256xf32>
    %20 = arith.mulf %18, %19 : vector<1x4x256xf32>
    %c0_15 = arith.constant 0 : index
    %c0_16 = arith.constant 0 : index
    %c0_17 = arith.constant 0 : index
    %21 = vector.load %arg4[%c0_15, %c0_16, %c0_17] : memref<1x4x256xf32, #tpu.memory_space<vmem>>, vector<1x4x256xf32>
    tpu.vector_store %arg4[%c0_15, %c0_16, %c0_17], %20 {strides = array<i32>} : memref<1x4x256xf32, #tpu.memory_space<vmem>>, vector<1x4x256xf32>,
    return
  }
  func.func @transform_0(%arg0: i32) -> (i32, i32, i32) {
    %c0_i32 = arith.constant 0 : i32
    %c0_i32_0 = arith.constant 0 : i32
    %c0_i32_1 = arith.constant 0 : i32
    return %arg0, %c0_i32, %c0_i32_0 : i32, i32, i32
  }
  func.func @transform_1(%arg0: i32) -> (i32, i32) {
    %c0_i32 = arith.constant 0 : i32
    %c0_i32_0 = arith.constant 0 : i32
    %c0_i32_1 = arith.constant 0 : i32
    return %c0_i32, %c0_i32_0 : i32, i32
  }
  func.func @transform_2(%arg0: i32) -> (i32, i32) {
    %c0_i32 = arith.constant 0 : i32
    %c0_i32_0 = arith.constant 0 : i32
    %c0_i32_1 = arith.constant 0 : i32
    return %c0_i32, %c0_i32_0 : i32, i32
  }
  func.func @transform_3(%arg0: i32) -> (i32, i32, i32) {
    %c0_i32 = arith.constant 0 : i32
    %c0_i32_0 = arith.constant 0 : i32
    %c0_i32_1 = arith.constant 0 : i32
    return %arg0, %c0_i32, %c0_i32_0 : i32, i32, i32
  }
}

</mosaic_0001>

<bundles_post_ra>
// kernel: tpu_custom_call.1
= control target key start
LH: loop header
LB: loop body
LE: loop exit
PB: predicated region body
PF: predicated region fallthrough
CT: control target
= control target key end

     0   :  { %8 = vsyncpa [#allocation3], 0  ;;  %s855_s0 = inlined_call_operand.hbm [shape: f32[2,4,256], index: 0, kind: input, shape index: {}]   ;;  %s856_s1 = inlined_call_operand.vmem [shape: f32[4,2], index: 1, kind: input, shape index: {}]   ;;  %s857_s2 = inlined_call_operand.vmem [shape: f32[2,4], index: 2, kind: input, shape index: {}]   ;;  %s858_s3 = inlined_call_operand.hbm [shape: f32[2,4,256], index: 3, kind: output, shape index: {}]  }
   0x1   :  { %10 = vsyncpa [#allocation3 + $0x1], 0 }
   0x2   :  { %11 = vsyncpa [#allocation4], 0 }
   0x3   :  { %13 = vsyncpa [#allocation4 + $0x1], 0  ;;  %s684_s12 = smov 0   ;;  %s686_s13 = smov 0  }
   0x4   :  { %s688_s14 = smov 0   ;;  %s690_s15 = smov 0  }
   0x5 LB: > { %s705_s16 = sadd.s32 4294967295, %s657_s15   ;;  %s472_s17 = sadd.s32 4294967294, %s657_s15   ;;  %s657_s15 = sphi %s690_s15, %s873_s15   ;;  %s653_s14 = sphi %s688_s14, %s872_s14   ;;  %s649_s13 = sphi %s686_s13, %s871_s13   ;;  %s645_s12 = sphi %s684_s12, %s870_s12  }
   0x6   : > { %s709_s18 = sadd.s32 1, %s657_s15   ;;  %s26_s19 = sadd.s32 1, %s653_s14 }
   0x7   : > { %s23_s20 = ssub.s32 %s657_s15, %s709_s18  ;;  %p33_p0 = scmp.ne.s32.totalorder %s653_s14, %s649_s13 }
   0x8   : > { %p24_p1 = scmp.eq.s32.totalorder %s23_s20, 0  ;;  %p34_p2 = scmp.eq.s32.totalorder %s657_s15, 0 }
   0x9   : > { %p39_p3 = scmp.ne.s32.totalorder %s649_s13, %s645_s12  ;;  %p40_p4 = scmp.eq.s32.totalorder %s705_s16, 0 }
   0xa   : > { %s721_s21 = scalar_select %p24_p1, %s653_s14, %s26_s19  }
   0xb   : > { %p723_p5 = por %p34_p2, %p33_p0  ;;  %p727_p6 = por %p40_p4, %p39_p3 }
   0xc   : > { %p105_p7 = scmp.eq.s32.totalorder %s705_s16, 1  ;;  %p111_p8 = scmp.eq.s32.totalorder %s472_s17, 1 }
   0xd   : > { %p519_p10 = scmp.lt.s32.totalorder %s657_s15, 2  ;;  %s137_s26 = sand.u32 1, %s653_s14  }
   0xe   : > { %p734_p11 = por %p105_p7, %p33_p0  ;;  %p738_p12 = por %p111_p8, %p39_p3 }
   0xf   : > { %s491_s27 = sshll.u32 %s657_s15, 7  ;;  %s475_s28 = sshll.u32 %s137_s26, 3 }
  0x10   : > { %s862_s24 = scalar_select %p734_p11, 1, 0 }
  0x11   : > { %s863_s25 = scalar_select %p738_p12, 1, 0 }
  0x12   : > { %s747_s4 = scalar_lea.hbm %s855_s0, %s491_s27  ;;  %s141_s5 = scalar_lea.vmem [#allocation2], %s475_s28 }
  0x13   : > { %s149_s6 = sshll.u32 %s141_s5, 4  ;;  %p751_p13 = pnand %p519_p10, %p723_p5  ;;  %s755_s6 = int_to_ptr.vmem [resolvable:$true] %s149_s6 }
  0x14   : > { %s138_s8 = scalar_lea.sflag [#allocation3], %s137_s26  ;;  %s561_s9 = scalar_lea.hbm %s747_s4, 128 }
  0x15   : > { %p562_p2 = scmp.ne.s32.totalorder %s747_s4, %s561_s9  ;;  %p563_p3 = pneg %p751_p13 }
  0x16   : > { %s566_s17 = scalar_lea.hbm %s855_s0, 256  ;;  %p567_p5 = scmp.lt.u32.totalorder %s747_s4, %s855_s0 }
  0x17   : > { %p564_p4 = pnand %p563_p3, %p562_p2  ;;  %p568_p8 = scmp.lt.u32.totalorder %s566_s17, %s561_s9 }
  0x18   : > { %p570_p9 = scmp.lt.u32.totalorder %s561_s9, %s747_s4 }
  0x19   : > { %p565_p7 = pneg %p564_p4  ;;  %p569_p10 = por %p568_p8, %p567_p5 }
  0x1b   : > { %p571_p0 = por %p570_p9, %p569_p10 }
  0x1d   : > { %p572_p1 = pnand %p571_p0, %p565_p7 }
  0x1f   : > { %575 = shalt.err (!%p572_p1)
}
  0x20   : > { %s576_s22 = scalar_lea.vmem %s755_s6, 128  ;;  %s659_s26 = smov [#allocation2]  }
  0x21   : > { %p577_p2 = scmp.ne.s32.totalorder %s755_s6, %s576_s22  ;;  %s581_s27 = sshll.u32 %s659_s26, 4  ;;  %s582_s27 = int_to_ptr.vmem [resolvable:$false] %s581_s27 }
  0x22   : > { %s583_s28 = scalar_lea.vmem %s582_s27, 256  ;;  %p584_p11 = scmp.lt.s32.totalorder %s755_s6, %s582_s27 }
  0x23   : > { %p579_p4 = pnand %p577_p2, %p563_p3  ;;  %p585_p5 = scmp.lt.s32.totalorder %s583_s28, %s576_s22 }
  0x25   : > { %p580_p12 = pneg %p579_p4  ;;  %p586_p8 = por %p585_p5, %p584_p11 }
  0x27   : > { %p587_p9 = pnand %p586_p8, %p580_p12 }
  0x29   : > { %590 = shalt.err (!%p587_p9)
}
  0x2a   : > { %514 = dma.hbm_to_vmem [thread:$0]  (!%p751_p13), %s747_s4, 128, %s755_s6, %s138_s8  }
  0x2b   : > { %p865_p0 = scmp.lt.s32.totalorder %s657_s15, 3  ;;  %p866_p1 = scmp.ge.s32.totalorder %s657_s15, 1 }
  0x2d   : > { %p155_p3 = pnand %p866_p1, %p865_p0 }
  0x2e   : > { %s789_s29 = sand.u32 (!%p155_p3), 1, %s649_s13  }
  0x2f   : > { %158 = sbr.rel (%p155_p3) target bundleno = 794 (0x31a), region = 32  ;;  %s479_s30 = sshll.u32 (!%p155_p3), %s789_s29, 3 }
  0x30   : > { %s161_s5 = scalar_lea.sflag (!%p155_p3), [#allocation3], %s789_s29  ;;  %s164_s7 = scalar_lea.vmem (!%p155_p3), [#allocation2], %s479_s30 }
  0x36   : > { %636 = dma.done.wait (%p727_p6), %s161_s5, 128  }
  0x37   : > { %638 = vsyncadd (%p727_p6), %s161_s5, 4294967168  ;;  %vm191_vm0 = vcmask 1043456   ;;  %v187_v0 = vld [vmem:[%s164_s7] sm:$0xff]  ;;  %v660_v5 = vmov 0.0   ;;  %vm661_vm1 = vmmov 0   ;;  %v201_v7 = vlaneseq  ;;  %s492_s9 = sshll.u32 %s705_s16, 7 }
  0x38   : > { %v189_v1 = vcombine.high %v187_v0, %v187_v0  ;;  %v192_v2 = vsel %vm191_vm0, %v187_v0, 0.0  ;;  %497 = vmatprep.subr.mxu0 %v660_v5  ;;  %v199_v6 = vld [vmem:[%s856_s1] sm:$0xf]  ;;  %502 = vmatprep.subr.mxu1 %v660_v5  ;;  %vm207_vm2 = vcmask 31744   ;;  %vm289_vm3 = vcmask 1041408   ;;  %s186_s10 = scalar_lea.vmem [#allocation5], %s479_s30  ;;  %s811_s20 = scalar_lea.hbm %s858_s3, %s492_s9 }
  0x39   : > { %498 = vmatpush3.msk.msra.mxu0 %vm191_vm0, %v199_v6  ;;  %499 = vmatprep.mubr.msk.f32.mxu0 %vm661_vm1, %v660_v5  ;;  %v202_v8 = vand.u32 127, %v201_v7  ;;  %v204_v9 = vshrl.u32 %v201_v7, 7  ;;  %v284_v14 = vld [vmem:[%s857_s2] sm:$0x3]  ;;  %vm285_vm4 = vcmask 15360   ;;  %s402_s11 = sshll.u32 %s186_s10, 4  ;;  %s813_s11 = int_to_ptr.vmem [resolvable:$true] %s402_s11 }
  0x3a   : > { %v193_v3 = vsel %vm191_vm0, %v189_v1, 0.0  ;;  %504 = vmatprep.mubr.msk.f32.mxu1 %vm661_vm1, %v660_v5  ;;  %503 = vmatpush3.msk.msra.mxu1 %vm289_vm3, %v284_v14  ;;  %v662_v26 = vmov 839922192   ;;  %s388_s22 = scalar_lea.sflag [#allocation4], %s789_s29  ;;  %s591_s26 = scalar_lea.vmem %s813_s11, 128 }
  0x3b   : > { %v194_v4 = vadd.f32 %v193_v3, %v192_v2  ;;  %v205_v10 = vsub.s32 %v202_v8, %v204_v9  ;;  %v371_v23 = vsub.s32 0, %v204_v9  ;;  %v378_v27 = vunpack.c.l.s4 %v662_v26  ;;  %p592_p6 = scmp.ne.s32.totalorder %s813_s11, %s591_s26  ;;  %p867_p11 = scmp.ne.s32.totalorder %s862_s24, 0 }
  0x3c   : > { %s663_s16 = smov [#allocation5]  }
  0x3d   : > { %195 = vadd.xlane.f32.xlu0 %v194_v4  ;;  %v379_v28 = vunpack.c.0.s8 %v378_v27  ;;  %p593_p12 = pnand %p592_p6, %p867_p11  ;;  %s595_s27 = sshll.u32 %s663_s16, 4  ;;  %s596_s27 = int_to_ptr.vmem [resolvable:$false] %s595_s27 }
  0x3e   : > { %s597_s28 = scalar_lea.vmem %s596_s27, 256  ;;  %p598_p7 = scmp.lt.s32.totalorder %s813_s11, %s596_s27 }
  0x3f   : > { %v382_v29 = vsub.s32 %v379_v28, %v204_v9  ;;  %p594_p13 = pneg %p593_p12  ;;  %p599_p10 = scmp.lt.s32.totalorder %s597_s28, %s591_s26 }
  0x41   : > { %p600_p2 = por %p599_p10, %p598_p7 }
  0x43   : > { %p601_p4 = pnand %p600_p2, %p594_p13 }
  0xca   : > { %v196_v11 = vpop.xlane.xlu0 %195 }
  0xcb   : > { %v198_v12 = vmul.f32 0.00390625, %v196_v11 }
  0xcd   : > { %v206_v13 = vrot.slane %v198_v12, %v205_v10 }
  0xcf   : > { %500 = vmatmul.mubr.msk.f32.vlgmr.msra.gmra.mrb[0].mxu0 %vm207_vm2, %v206_v13 }
 0x1a2   : > { %v279_v15 = vpop.f32.mrb[0].mxu0 }
 0x1a3   : > { %v283_v16 = vmax.f32 %v279_v15, 0.0  ;;  %v501_v17 = vpop.f32.mrb[1].mxu0 }
 0x1a5   : > { %505 = vmatmul.mubr.msk.f32.vlgmr.msra.gmra.mrb[0].mxu1 %vm285_vm4, %v283_v16 }
 0x278   : > { %v359_v18 = vpop.f32.mrb[0].mxu1 }
 0x279   : > { %v485_v19 = vmul.f32 -1.442695, %v359_v18  ;;  %v506_v20 = vpop.f32.mrb[1].mxu1 }
 0x27b   : > { %557 = vpow2.f32 %v485_v19 }
 0x285   : > { %v558_v21 = vpop.eup %557 }
 0x286   : > { %v366_v22 = vadd.f32 1.0, %v558_v21 }
 0x288   : > { %559 = vrcp.f32 %v366_v22 }
 0x292   : > { %v560_v24 = vpop.eup %559 }
 0x293   : > { %v372_v25 = vrot.slane %v560_v24, %v371_v23 }
 0x295   : > { %374 = vbcast.lane.b32.xlu0 %v372_v25, 256 }
 0x307   : > { %v375_v30 = vpop.permute.xlu0 %374 }
 0x308   : > { %v383_v31 = vrot.slane %v375_v30, %v382_v29 }
 0x30a   : > { %v385_v32 = vmul.f32 %v383_v31, %v187_v0 }
 0x30c   : > { %386 = vst [vmem:[%s186_s10] sm:$0xff] %v385_v32 }
 0x30d   : > { %604 = shalt.err (!%p601_p4)
}
 0x30e   : > { %s605_s29 = scalar_lea.hbm %s811_s20, 128  ;;  %s609_s7 = scalar_lea.hbm %s858_s3, 256 }
 0x30f   : > { %p606_p5 = scmp.ne.s32.totalorder %s811_s20, %s605_s29  ;;  %p610_p0 = scmp.lt.u32.totalorder %s811_s20, %s858_s3 }
 0x310   : > { %p611_p1 = scmp.lt.u32.totalorder %s609_s7, %s605_s29  ;;  %p613_p6 = scmp.lt.u32.totalorder %s605_s29, %s811_s20 }
 0x311   : > { %p607_p8 = pnand %p606_p5, %p867_p11 }
 0x312   : > { %p612_p3 = por %p611_p1, %p610_p0 }
 0x313   : > { %p608_p9 = pneg %p607_p8 }
 0x314   : > { %p614_p12 = por %p613_p6, %p612_p3 }
 0x316   : > { %p615_p13 = pnand %p614_p12, %p608_p9 }
 0x318   : > { %618 = shalt.err (!%p615_p13)
}
 0x319   : > { %509 = dma.vmem_to_hbm [thread:$0]  (%p867_p11), %s813_s11, 128, %s811_s20, %s388_s22  }
 0x31a PF: > { %s414_s23 = sand.u32 1, %s645_s12   ;;  %p868_p7 = scmp.ne.s32.totalorder %s863_s25, 0 }
 0x31b   : > { %p869_p10 = scmp.ge.s32.totalorder %s657_s15, 2  ;;  %s415_s8 = scalar_lea.sflag [#allocation4], %s414_s23 }
 0x31d   : > { %p516_p2 = pnand %p869_p10, %p868_p7 }
 0x31f   : > { %640 = dma.done.wait (!%p516_p2), %s415_s8, 128  }
 0x320   : > { %642 = vsyncadd (!%p516_p2), %s415_s8, 4294967168  ;;  %p16_p4 = scmp.ge.s32.totalorder %s709_s18, 4   ;;  %s870_s12 = smov %s649_s13 }
 0x321   : > { %s871_s13 = smov %s653_s14  ;;  %s872_s14 = smov %s721_s21 }
 0x322   : > { %s873_s15 = smov %s709_s18  ;;  %18 = sbr.rel (!%p16_p4) target bundleno = 5 (0x5), region = 77 }
 0x329   :  { %420 = vsyncpa [#allocation3], 1 }
 0x32a   :  { %422 = vsyncpa [#allocation3 + $0x1], 1 }
 0x32b   :  { %423 = vsyncpa [#allocation4], 1 }
 0x32c   :  { %425 = vsyncpa [#allocation4 + $0x1], 1 }

</bundles_post_ra>
